<compile_context>
chip_gen: v7x
topology: tpu7x:2x2x1
jax: 0.10.0
libtpu: 0.0.40
codegen_flags: <defaults>
</compile_context>

<pallas_src>
import jax
import jax.numpy as jnp
from jax import lax
from jax.experimental import pallas as pl
from jax.experimental.pallas import tpu as pltpu


def rnn_fc_kernel(emb_ref, wih_ref, whh_ref, brnn_ref, wfc_ref, bfc_ref,
                  out_ref, hs_ref):
    """Vanilla RNN recurrence with hoisted input/fc projections.

    emb_ref : (T, Bb, Ep)  f32   time-major embedded inputs (padded)
    wih_ref : (Ep, Hp)     f32   W_ih^T (padded)
    whh_ref : (Hp, Hp)     f32   W_hh^T (padded)
    brnn_ref: (1, Hp)      f32   b_ih + b_hh (padded)
    wfc_ref : (Hp, Lp)     f32   W_fc^T (padded)
    bfc_ref : (1, Lp)      f32   b_fc (padded)
    out_ref : (T, Bb, Lp)  f32   per-timestep logits (padded)
    hs_ref  : (T*Bb, Hp)   f32   scratch: holds pre-activations, then h_t
    """
    T, Bb, Ep = emb_ref.shape
    Hp = whh_ref.shape[0]
    Lp = wfc_ref.shape[1]

    # (1) Input projection + combined bias as ONE matmul (off the serial
    #     critical path).  Result lands in the hidden slab; each slot is read
    #     exactly once before being overwritten with h_t.
    x = emb_ref[...].reshape(T * Bb, Ep)
    hs_ref[...] = (
        jnp.dot(x, wih_ref[...], preferred_element_type=jnp.float32)
        + brnn_ref[...])

    # (2) Serial recurrence: h stays in registers, weights loaded once,
    #     loop fully unrolled (T is a static Python int).
    whh = whh_ref[...]
    h = jnp.zeros((Bb, Hp), jnp.float32)            # h_0 = 0 (PyTorch default)
    for t in range(T):
        i = t * Bb                                  # static, sublane-aligned
        h = jnp.tanh(
            hs_ref[pl.ds(i, Bb), :]
            + jnp.dot(h, whh, preferred_element_type=jnp.float32))
        hs_ref[pl.ds(i, Bb), :] = h

    # (3) fc projection as ONE matmul + a single lane-dense store.
    logits = (
        jnp.dot(hs_ref[...], wfc_ref[...], preferred_element_type=jnp.float32)
        + bfc_ref[...])
    out_ref[...] = logits.reshape(T, Bb, Lp)


def _pad_to(x, shape):
    return jnp.pad(x, [(0, s - d) for d, s in zip(x.shape, shape)])


def _round_up(n, m):
    return ((n + m - 1) // m) * m


def rnn_forward(x_ids, emb_table, w_ih, w_hh, b_ih, b_hh, w_fc, b_fc,
                *, batch_block=8):
    """Equivalent of RNN.forward(x): returns (B, T, label_size)."""
    # Embedding lookup (gather) kept in JAX glue.
    emout = jnp.take(emb_table, x_ids, axis=0)          # (B, T, E)
    B, T, E = emout.shape
    H = w_hh.shape[0]
    L = w_fc.shape[0]

    # Pad to hardware tiles: sublanes (8) for batch, lanes (128) for E/H/L.
    Bp = _round_up(B, batch_block)
    Ep = _round_up(E, 128)
    Hp = _round_up(H, 128)
    Lp = _round_up(L, 128)
    nb = Bp // batch_block

    emb_tm = jnp.transpose(emout, (1, 0, 2)).astype(jnp.float32)   # (T, B, E)
    emb_tm = _pad_to(emb_tm, (T, Bp, Ep))

    wih = _pad_to(w_ih.T.astype(jnp.float32), (Ep, Hp))
    whh = _pad_to(w_hh.T.astype(jnp.float32), (Hp, Hp))
    brnn = _pad_to((b_ih + b_hh).astype(jnp.float32).reshape(1, H), (1, Hp))
    wfc = _pad_to(w_fc.T.astype(jnp.float32), (Hp, Lp))
    bfc = _pad_to(b_fc.astype(jnp.float32).reshape(1, L), (1, Lp))

    out_tm = pl.pallas_call(
        rnn_fc_kernel,
        out_shape=jax.ShapeDtypeStruct((T, Bp, Lp), jnp.float32),
        grid_spec=pltpu.PrefetchScalarGridSpec(
            num_scalar_prefetch=0,
            grid=(nb,),                                   # parallel over batch blocks
            in_specs=[
                pl.BlockSpec((T, batch_block, Ep), lambda b: (0, b, 0)),
                pl.BlockSpec((Ep, Hp), lambda b: (0, 0)),
                pl.BlockSpec((Hp, Hp), lambda b: (0, 0)),
                pl.BlockSpec((1, Hp), lambda b: (0, 0)),
                pl.BlockSpec((Hp, Lp), lambda b: (0, 0)),
                pl.BlockSpec((1, Lp), lambda b: (0, 0)),
            ],
            out_specs=pl.BlockSpec((T, batch_block, Lp), lambda b: (0, b, 0)),
            scratch_shapes=[pltpu.VMEM((T * batch_block, Hp), jnp.float32)],
        ),
        compiler_params=pltpu.CompilerParams(
            dimension_semantics=("parallel",)),
    )(emb_tm, wih, whh, brnn, wfc, bfc)

    out = out_tm[:, :B, :L]                              # drop padding
    return jnp.transpose(out, (1, 0, 2))                 # (B, T, L)


def rnn_forward_ref(x_ids, emb_table, w_ih, w_hh, b_ih, b_hh, w_fc, b_fc):
    """Pure-JAX reference matching torch semantics."""
    emout = jnp.take(emb_table, x_ids, axis=0)           # (B, T, E)
    B, T, E = emout.shape
    H = w_hh.shape[0]

    def step(h, x_t):
        h_new = jnp.tanh(x_t @ w_ih.T + b_ih + h @ w_hh.T + b_hh)
        return h_new, h_new

    h0 = jnp.zeros((B, H), jnp.float32)
    _, hs = lax.scan(step, h0, jnp.transpose(emout, (1, 0, 2)))  # (T, B, H)
    hs = jnp.transpose(hs, (1, 0, 2))                            # (B, T, H)
    out = hs.reshape(-1, H) @ w_fc.T + b_fc
    return out.reshape(B, T, -1)


if __name__ == "__main__":
    # Small, deterministic setup (synthetic weights; no checkpoint load).
    wordsn = 50
    E = 10          # word_embed_size
    H = 10          # rnn_hidden_size
    L = 17          # label_size
    B = 2           # batch
    T = 8           # sequence length

    key = jax.random.PRNGKey(0)
    k = jax.random.split(key, 8)
    emb_table = jax.random.normal(k[0], (wordsn, E), jnp.float32)
    w_ih = jax.random.normal(k[1], (H, E), jnp.float32) * 0.3
    w_hh = jax.random.normal(k[2], (H, H), jnp.float32) * 0.3
    b_ih = jax.random.normal(k[3], (H,), jnp.float32) * 0.1
    b_hh = jax.random.normal(k[4], (H,), jnp.float32) * 0.1
    w_fc = jax.random.normal(k[5], (L, H), jnp.float32) * 0.3
    b_fc = jax.random.normal(k[6], (L,), jnp.float32) * 0.1
    x_ids = jax.random.randint(k[7], (B, T), 0, wordsn, dtype=jnp.int32)

    out = rnn_forward(x_ids, emb_table, w_ih, w_hh, b_ih, b_hh, w_fc, b_fc)
    out = jax.block_until_ready(out)

    ref = rnn_forward_ref(x_ids, emb_table, w_ih, w_hh, b_ih, b_hh, w_fc, b_fc)
    ref = jax.block_until_ready(ref)

    assert out.shape == (B, T, L), out.shape
    assert jnp.allclose(out, ref, atol=1e-5, rtol=1e-5), \
        float(jnp.max(jnp.abs(out - ref)))

    print("KERNEL_OK")
</pallas_src>

<mosaic_0001>
module attributes {stable_mosaic.version = 11 : i64} {
  func.func @rnn_fc_kernel(%arg0: i32, %arg1: memref<8x8x128xf32, #tpu.memory_space<vmem>>, %arg2: memref<128x128xf32, #tpu.memory_space<vmem>>, %arg3: memref<128x128xf32, #tpu.memory_space<vmem>>, %arg4: memref<1x128xf32, #tpu.memory_space<vmem>>, %arg5: memref<128x128xf32, #tpu.memory_space<vmem>>, %arg6: memref<1x128xf32, #tpu.memory_space<vmem>>, %arg7: memref<8x8x128xf32, #tpu.memory_space<vmem>>, %arg8: memref<64x128xf32, #tpu.memory_space<vmem>>) attributes {dimension_semantics = [#tpu.dimension_semantics<parallel>], iteration_bounds = array<i64: 1>, scalar_prefetch = 0 : i64, scratch_operands = 1 : i64, tpu.core_type = #tpu.core_type<tc>, window_params = [{transform_indices = @transform_0, window_bounds = array<i64: 8, 8, 128>}, {pipeline_mode = #tpu.pipeline_mode<synchronous>, transform_indices = @transform_1, window_bounds = array<i64: 128, 128>}, {pipeline_mode = #tpu.pipeline_mode<synchronous>, transform_indices = @transform_2, window_bounds = array<i64: 128, 128>}, {pipeline_mode = #tpu.pipeline_mode<synchronous>, transform_indices = @transform_3, window_bounds = array<i64: 1, 128>}, {pipeline_mode = #tpu.pipeline_mode<synchronous>, transform_indices = @transform_4, window_bounds = array<i64: 128, 128>}, {pipeline_mode = #tpu.pipeline_mode<synchronous>, transform_indices = @transform_5, window_bounds = array<i64: 1, 128>}, {transform_indices = @transform_6, window_bounds = array<i64: 8, 8, 128>}]} {
    %c0 = arith.constant 0 : index
    %c0_0 = arith.constant 0 : index
    %c0_1 = arith.constant 0 : index
    %0 = vector.load %arg1[%c0, %c0_0, %c0_1] : memref<8x8x128xf32, #tpu.memory_space<vmem>>, vector<8x8x128xf32>
    %1 = vector.shape_cast %0 : vector<8x8x128xf32> to vector<64x128xf32>
    %c0_2 = arith.constant 0 : index
    %c0_3 = arith.constant 0 : index
    %2 = vector.load %arg2[%c0_2, %c0_3] : memref<128x128xf32, #tpu.memory_space<vmem>>, vector<128x128xf32>
    %cst = arith.constant dense<0.000000e+00> : vector<64x128xf32>
    %3 = tpu.matmul %1, %2, %cst {dimension_numbers = #tpu.dot_dimension_numbers<[1], [0], [0], [1], [0, 0, 1, 1], [], []>} : vector<64x128xf32>, vector<128x128xf32>, vector<64x128xf32> -> vector<64x128xf32>
    %c0_4 = arith.constant 0 : index
    %c0_5 = arith.constant 0 : index
    %4 = vector.load %arg4[%c0_4, %c0_5] : memref<1x128xf32, #tpu.memory_space<vmem>>, vector<1x128xf32>
    %5 = vector.broadcast %4 : vector<1x128xf32> to vector<64x128xf32>
    %6 = arith.addf %3, %5 : vector<64x128xf32>
    %c0_6 = arith.constant 0 : index
    %c0_7 = arith.constant 0 : index
    %7 = vector.load %arg8[%c0_6, %c0_7] : memref<64x128xf32, #tpu.memory_space<vmem>>, vector<64x128xf32>
    tpu.vector_store %arg8[%c0_6, %c0_7], %6 {strides = array<i32>} : memref<64x128xf32, #tpu.memory_space<vmem>>, vector<64x128xf32>,
    %c0_8 = arith.constant 0 : index
    %c0_9 = arith.constant 0 : index
    %8 = vector.load %arg3[%c0_8, %c0_9] : memref<128x128xf32, #tpu.memory_space<vmem>>, vector<128x128xf32>
    %cst_10 = arith.constant 0.000000e+00 : f32
    %9 = vector.broadcast %cst_10 : f32 to vector<8x128xf32>
    %c0_11 = arith.constant 0 : index
    %c0_12 = arith.constant 0 : index
    %10 = vector.load %arg8[%c0_11, %c0_12] : memref<64x128xf32, #tpu.memory_space<vmem>>, vector<8x128xf32>
    %cst_13 = arith.constant dense<0.000000e+00> : vector<8x128xf32>
    %11 = tpu.matmul %9, %8, %cst_13 {dimension_numbers = #tpu.dot_dimension_numbers<[1], [0], [0], [1], [0, 0, 1, 1], [], []>} : vector<8x128xf32>, vector<128x128xf32>, vector<8x128xf32> -> vector<8x128xf32>
    %12 = arith.addf %10, %11 : vector<8x128xf32>
    %13 = math.tanh %12 : vector<8x128xf32>
    %c0_14 = arith.constant 0 : index
    %c0_15 = arith.constant 0 : index
    %14 = vector.load %arg8[%c0_14, %c0_15] : memref<64x128xf32, #tpu.memory_space<vmem>>, vector<8x128xf32>
    tpu.vector_store %arg8[%c0_14, %c0_15], %13 {strides = array<i32>} : memref<64x128xf32, #tpu.memory_space<vmem>>, vector<8x128xf32>,
    %c8 = arith.constant 8 : index
    %c0_16 = arith.constant 0 : index
    %15 = vector.load %arg8[%c8, %c0_16] : memref<64x128xf32, #tpu.memory_space<vmem>>, vector<8x128xf32>
    %cst_17 = arith.constant dense<0.000000e+00> : vector<8x128xf32>
    %16 = tpu.matmul %13, %8, %cst_17 {dimension_numbers = #tpu.dot_dimension_numbers<[1], [0], [0], [1], [0, 0, 1, 1], [], []>} : vector<8x128xf32>, vector<128x128xf32>, vector<8x128xf32> -> vector<8x128xf32>
    %17 = arith.addf %15, %16 : vector<8x128xf32>
    %18 = math.tanh %17 : vector<8x128xf32>
    %c8_18 = arith.constant 8 : index
    %c0_19 = arith.constant 0 : index
    %19 = vector.load %arg8[%c8_18, %c0_19] : memref<64x128xf32, #tpu.memory_space<vmem>>, vector<8x128xf32>
    tpu.vector_store %arg8[%c8_18, %c0_19], %18 {strides = array<i32>} : memref<64x128xf32, #tpu.memory_space<vmem>>, vector<8x128xf32>,
    %c16 = arith.constant 16 : index
    %c0_20 = arith.constant 0 : index
    %20 = vector.load %arg8[%c16, %c0_20] : memref<64x128xf32, #tpu.memory_space<vmem>>, vector<8x128xf32>
    %cst_21 = arith.constant dense<0.000000e+00> : vector<8x128xf32>
    %21 = tpu.matmul %18, %8, %cst_21 {dimension_numbers = #tpu.dot_dimension_numbers<[1], [0], [0], [1], [0, 0, 1, 1], [], []>} : vector<8x128xf32>, vector<128x128xf32>, vector<8x128xf32> -> vector<8x128xf32>
    %22 = arith.addf %20, %21 : vector<8x128xf32>
    %23 = math.tanh %22 : vector<8x128xf32>
    %c16_22 = arith.constant 16 : index
    %c0_23 = arith.constant 0 : index
    %24 = vector.load %arg8[%c16_22, %c0_23] : memref<64x128xf32, #tpu.memory_space<vmem>>, vector<8x128xf32>
    tpu.vector_store %arg8[%c16_22, %c0_23], %23 {strides = array<i32>} : memref<64x128xf32, #tpu.memory_space<vmem>>, vector<8x128xf32>,
    %c24 = arith.constant 24 : index
    %c0_24 = arith.constant 0 : index
    %25 = vector.load %arg8[%c24, %c0_24] : memref<64x128xf32, #tpu.memory_space<vmem>>, vector<8x128xf32>
    %cst_25 = arith.constant dense<0.000000e+00> : vector<8x128xf32>
    %26 = tpu.matmul %23, %8, %cst_25 {dimension_numbers = #tpu.dot_dimension_numbers<[1], [0], [0], [1], [0, 0, 1, 1], [], []>} : vector<8x128xf32>, vector<128x128xf32>, vector<8x128xf32> -> vector<8x128xf32>
    %27 = arith.addf %25, %26 : vector<8x128xf32>
    %28 = math.tanh %27 : vector<8x128xf32>
    %c24_26 = arith.constant 24 : index
    %c0_27 = arith.constant 0 : index
    %29 = vector.load %arg8[%c24_26, %c0_27] : memref<64x128xf32, #tpu.memory_space<vmem>>, vector<8x128xf32>
    tpu.vector_store %arg8[%c24_26, %c0_27], %28 {strides = array<i32>} : memref<64x128xf32, #tpu.memory_space<vmem>>, vector<8x128xf32>,
    %c32 = arith.constant 32 : index
    %c0_28 = arith.constant 0 : index
    %30 = vector.load %arg8[%c32, %c0_28] : memref<64x128xf32, #tpu.memory_space<vmem>>, vector<8x128xf32>
    %cst_29 = arith.constant dense<0.000000e+00> : vector<8x128xf32>
    %31 = tpu.matmul %28, %8, %cst_29 {dimension_numbers = #tpu.dot_dimension_numbers<[1], [0], [0], [1], [0, 0, 1, 1], [], []>} : vector<8x128xf32>, vector<128x128xf32>, vector<8x128xf32> -> vector<8x128xf32>
    %32 = arith.addf %30, %31 : vector<8x128xf32>
    %33 = math.tanh %32 : vector<8x128xf32>
    %c32_30 = arith.constant 32 : index
    %c0_31 = arith.constant 0 : index
    %34 = vector.load %arg8[%c32_30, %c0_31] : memref<64x128xf32, #tpu.memory_space<vmem>>, vector<8x128xf32>
    tpu.vector_store %arg8[%c32_30, %c0_31], %33 {strides = array<i32>} : memref<64x128xf32, #tpu.memory_space<vmem>>, vector<8x128xf32>,
    %c40 = arith.constant 40 : index
    %c0_32 = arith.constant 0 : index
    %35 = vector.load %arg8[%c40, %c0_32] : memref<64x128xf32, #tpu.memory_space<vmem>>, vector<8x128xf32>
    %cst_33 = arith.constant dense<0.000000e+00> : vector<8x128xf32>
    %36 = tpu.matmul %33, %8, %cst_33 {dimension_numbers = #tpu.dot_dimension_numbers<[1], [0], [0], [1], [0, 0, 1, 1], [], []>} : vector<8x128xf32>, vector<128x128xf32>, vector<8x128xf32> -> vector<8x128xf32>
    %37 = arith.addf %35, %36 : vector<8x128xf32>
    %38 = math.tanh %37 : vector<8x128xf32>
    %c40_34 = arith.constant 40 : index
    %c0_35 = arith.constant 0 : index
    %39 = vector.load %arg8[%c40_34, %c0_35] : memref<64x128xf32, #tpu.memory_space<vmem>>, vector<8x128xf32>
    tpu.vector_store %arg8[%c40_34, %c0_35], %38 {strides = array<i32>} : memref<64x128xf32, #tpu.memory_space<vmem>>, vector<8x128xf32>,
    %c48 = arith.constant 48 : index
    %c0_36 = arith.constant 0 : index
    %40 = vector.load %arg8[%c48, %c0_36] : memref<64x128xf32, #tpu.memory_space<vmem>>, vector<8x128xf32>
    %cst_37 = arith.constant dense<0.000000e+00> : vector<8x128xf32>
    %41 = tpu.matmul %38, %8, %cst_37 {dimension_numbers = #tpu.dot_dimension_numbers<[1], [0], [0], [1], [0, 0, 1, 1], [], []>} : vector<8x128xf32>, vector<128x128xf32>, vector<8x128xf32> -> vector<8x128xf32>
    %42 = arith.addf %40, %41 : vector<8x128xf32>
    %43 = math.tanh %42 : vector<8x128xf32>
    %c48_38 = arith.constant 48 : index
    %c0_39 = arith.constant 0 : index
    %44 = vector.load %arg8[%c48_38, %c0_39] : memref<64x128xf32, #tpu.memory_space<vmem>>, vector<8x128xf32>
    tpu.vector_store %arg8[%c48_38, %c0_39], %43 {strides = array<i32>} : memref<64x128xf32, #tpu.memory_space<vmem>>, vector<8x128xf32>,
    %c56 = arith.constant 56 : index
    %c0_40 = arith.constant 0 : index
    %45 = vector.load %arg8[%c56, %c0_40] : memref<64x128xf32, #tpu.memory_space<vmem>>, vector<8x128xf32>
    %cst_41 = arith.constant dense<0.000000e+00> : vector<8x128xf32>
    %46 = tpu.matmul %43, %8, %cst_41 {dimension_numbers = #tpu.dot_dimension_numbers<[1], [0], [0], [1], [0, 0, 1, 1], [], []>} : vector<8x128xf32>, vector<128x128xf32>, vector<8x128xf32> -> vector<8x128xf32>
    %47 = arith.addf %45, %46 : vector<8x128xf32>
    %48 = math.tanh %47 : vector<8x128xf32>
    %c56_42 = arith.constant 56 : index
    %c0_43 = arith.constant 0 : index
    %49 = vector.load %arg8[%c56_42, %c0_43] : memref<64x128xf32, #tpu.memory_space<vmem>>, vector<8x128xf32>
    tpu.vector_store %arg8[%c56_42, %c0_43], %48 {strides = array<i32>} : memref<64x128xf32, #tpu.memory_space<vmem>>, vector<8x128xf32>,
    %c0_44 = arith.constant 0 : index
    %c0_45 = arith.constant 0 : index
    %50 = vector.load %arg8[%c0_44, %c0_45] : memref<64x128xf32, #tpu.memory_space<vmem>>, vector<64x128xf32>
    %c0_46 = arith.constant 0 : index
    %c0_47 = arith.constant 0 : index
    %51 = vector.load %arg5[%c0_46, %c0_47] : memref<128x128xf32, #tpu.memory_space<vmem>>, vector<128x128xf32>
    %cst_48 = arith.constant dense<0.000000e+00> : vector<64x128xf32>
    %52 = tpu.matmul %50, %51, %cst_48 {dimension_numbers = #tpu.dot_dimension_numbers<[1], [0], [0], [1], [0, 0, 1, 1], [], []>} : vector<64x128xf32>, vector<128x128xf32>, vector<64x128xf32> -> vector<64x128xf32>
    %c0_49 = arith.constant 0 : index
    %c0_50 = arith.constant 0 : index
    %53 = vector.load %arg6[%c0_49, %c0_50] : memref<1x128xf32, #tpu.memory_space<vmem>>, vector<1x128xf32>
    %54 = vector.broadcast %53 : vector<1x128xf32> to vector<64x128xf32>
    %55 = arith.addf %52, %54 : vector<64x128xf32>
    %56 = vector.shape_cast %55 : vector<64x128xf32> to vector<8x8x128xf32>
    %c0_51 = arith.constant 0 : index
    %c0_52 = arith.constant 0 : index
    %c0_53 = arith.constant 0 : index
    %57 = vector.load %arg7[%c0_51, %c0_52, %c0_53] : memref<8x8x128xf32, #tpu.memory_space<vmem>>, vector<8x8x128xf32>
    tpu.vector_store %arg7[%c0_51, %c0_52, %c0_53], %56 {strides = array<i32>} : memref<8x8x128xf32, #tpu.memory_space<vmem>>, vector<8x8x128xf32>,
    return
  }
  func.func @transform_0(%arg0: i32) -> (i32, i32, i32) {
    %c0_i32 = arith.constant 0 : i32
    %c0_i32_0 = arith.constant 0 : i32
    %c0_i32_1 = arith.constant 0 : i32
    return %c0_i32, %arg0, %c0_i32_0 : i32, i32, i32
  }
  func.func @transform_1(%arg0: i32) -> (i32, i32) {
    %c0_i32 = arith.constant 0 : i32
    %c0_i32_0 = arith.constant 0 : i32
    %c0_i32_1 = arith.constant 0 : i32
    return %c0_i32, %c0_i32_0 : i32, i32
  }
  func.func @transform_2(%arg0: i32) -> (i32, i32) {
    %c0_i32 = arith.constant 0 : i32
    %c0_i32_0 = arith.constant 0 : i32
    %c0_i32_1 = arith.constant 0 : i32
    return %c0_i32, %c0_i32_0 : i32, i32
  }
  func.func @transform_3(%arg0: i32) -> (i32, i32) {
    %c0_i32 = arith.constant 0 : i32
    %c0_i32_0 = arith.constant 0 : i32
    %c0_i32_1 = arith.constant 0 : i32
    return %c0_i32, %c0_i32_0 : i32, i32
  }
  func.func @transform_4(%arg0: i32) -> (i32, i32) {
    %c0_i32 = arith.constant 0 : i32
    %c0_i32_0 = arith.constant 0 : i32
    %c0_i32_1 = arith.constant 0 : i32
    return %c0_i32, %c0_i32_0 : i32, i32
  }
  func.func @transform_5(%arg0: i32) -> (i32, i32) {
    %c0_i32 = arith.constant 0 : i32
    %c0_i32_0 = arith.constant 0 : i32
    %c0_i32_1 = arith.constant 0 : i32
    return %c0_i32, %c0_i32_0 : i32, i32
  }
  func.func @transform_6(%arg0: i32) -> (i32, i32, i32) {
    %c0_i32 = arith.constant 0 : i32
    %c0_i32_0 = arith.constant 0 : i32
    %c0_i32_1 = arith.constant 0 : i32
    return %c0_i32, %arg0, %c0_i32_0 : i32, i32, i32
  }
}

</mosaic_0001>

<bundles_post_ra>
// kernel: tpu_custom_call.1
= control target key start
LH: loop header
LB: loop body
LE: loop exit
PB: predicated region body
PF: predicated region fallthrough
CT: control target
= control target key end

     0   :  { %11 = vsyncpa [#allocation4], 0  ;;  %s2291_s0 = inlined_call_operand.hbm [shape: f32[8,8,128], index: 0, kind: input, shape index: {}]   ;;  %s2292_s1 = inlined_call_operand.hbm [shape: f32[128,128], index: 1, kind: input, shape index: {}]   ;;  %s2293_s2 = inlined_call_operand.hbm [shape: f32[128,128], index: 2, kind: input, shape index: {}]   ;;  %s2294_s3 = inlined_call_operand.vmem [shape: f32[1,128], index: 3, kind: input, shape index: {}]   ;;  %s2295_s4 = inlined_call_operand.hbm [shape: f32[128,128], index: 4, kind: input, shape index: {}]   ;;  %s2296_s5 = inlined_call_operand.vmem [shape: f32[1,128], index: 5, kind: input, shape index: {}]   ;;  %s2297_s6 = inlined_call_operand.hbm [shape: f32[8,8,128], index: 6, kind: output, shape index: {}]  }
   0x1   :  { %12 = vsyncpa [#allocation7], 0 }
   0x2   :  { %13 = vsyncpa [#allocation10], 0 }
   0x3   :  { %14 = vsyncpa [#allocation5], 0  ;;  %s1948_s21 = smov [#allocation6]   ;;  %s1949_s23 = smov [#allocation3]  }
   0x4   :  { %s32_s22 = sshll.u32 %s1948_s21, 4  ;;  %s20_s24 = sshll.u32 %s1949_s23, 4  ;;  %s33_s22 = int_to_ptr.vmem [resolvable:$true] %s32_s22  ;;  %s1993_s24 = int_to_ptr.vmem [resolvable:$true] %s20_s24 }
   0x5   :  { %s1830_s27 = scalar_lea.hbm %s2292_s1, 2048 }
   0x6   :  { %p1831_p0 = scmp.ne.s32.totalorder %s2292_s1, %s1830_s27  ;;  %p1834_p1 = scmp.lt.u32.totalorder %s1830_s27, %s2292_s1 }
   0x8   :  { %p1836_p2 = pnand %p1834_p1, %p1831_p0 }
   0xa   :  { %1839 = shalt.err (!%p1836_p2)
}
   0xb   :  { %s1840_s8 = scalar_lea.vmem %s33_s22, 2048  ;;  %p1845_p4 = scmp.lt.s32.totalorder %s33_s22, %s33_s22 }
   0xc   :  { %p1841_p3 = scmp.ne.s32.totalorder %s33_s22, %s1840_s8  ;;  %p1846_p5 = scmp.lt.s32.totalorder %s1840_s8, %s1840_s8 }
   0xe   :  { %p1847_p6 = por %p1846_p5, %p1845_p4 }
  0x10   :  { %p1848_p7 = pnand %p1847_p6, %p1841_p3 }
  0x12   :  { %1851 = shalt.err (!%p1848_p7)
}
  0x13   :  { %s1950_s9 = smov 128   ;;  %s1951_s10 = smov 8  }
  0x14   :  { %38 = dma.hbm_to_vmem [thread:$0]  %s2292_s1, 2048, %s33_s22, [#allocation7], %s1950_s9, %s1950_s9, %s1951_s10  }
  0x15   :  { %s1852_s15 = scalar_lea.hbm %s2291_s0, 1024 }
  0x16   :  { %p1853_p8 = scmp.ne.s32.totalorder %s2291_s0, %s1852_s15  ;;  %p1856_p9 = scmp.lt.u32.totalorder %s1852_s15, %s2291_s0 }
  0x18   :  { %p1858_p10 = pnand %p1856_p9, %p1853_p8 }
  0x1a   :  { %1861 = shalt.err (!%p1858_p10)
}
  0x1b   :  { %s1862_s20 = scalar_lea.vmem %s1993_s24, 1024  ;;  %p1867_p12 = scmp.lt.s32.totalorder %s1993_s24, %s1993_s24 }
  0x1c   :  { %p1863_p11 = scmp.ne.s32.totalorder %s1993_s24, %s1862_s20  ;;  %p1868_p13 = scmp.lt.s32.totalorder %s1862_s20, %s1862_s20 }
  0x1e   :  { %p1869_p0 = por %p1868_p13, %p1867_p12 }
  0x20   :  { %p1870_p1 = pnand %p1869_p0, %p1863_p11 }
  0x22   :  { %1873 = shalt.err (!%p1870_p1)
}
  0x23   :  { %26 = dma.hbm_to_vmem [thread:$0]  %s2291_s0, 1024, %s1993_s24, [#allocation4], %s1950_s9, %s1950_s9, %s1951_s10  }
  0x24   :  { %s1952_s22 = smov [#allocation8]   ;;  %s1953_s25 = smov [#allocation9]  }
  0x25   :  { %s44_s23 = sshll.u32 %s1952_s22, 4  ;;  %s58_s26 = sshll.u32 %s1953_s25, 4  ;;  %s45_s23 = int_to_ptr.vmem [resolvable:$true] %s44_s23  ;;  %s2030_s26 = int_to_ptr.vmem [resolvable:$true] %s58_s26 }
  0x26   :  { %s1874_s29 = scalar_lea.hbm %s2293_s2, 2048 }
  0x27   :  { %p1875_p2 = scmp.ne.s32.totalorder %s2293_s2, %s1874_s29  ;;  %p1878_p3 = scmp.lt.u32.totalorder %s1874_s29, %s2293_s2 }
  0x29   :  { %p1880_p4 = pnand %p1878_p3, %p1875_p2 }
  0x2b   :  { %1883 = shalt.err (!%p1880_p4)
}
  0x2c   :  { %s1884_s0 = scalar_lea.vmem %s45_s23, 2048  ;;  %p1889_p6 = scmp.lt.s32.totalorder %s45_s23, %s45_s23 }
  0x2d   :  { %p1885_p5 = scmp.ne.s32.totalorder %s45_s23, %s1884_s0  ;;  %p1890_p7 = scmp.lt.s32.totalorder %s1884_s0, %s1884_s0 }
  0x2f   :  { %p1891_p8 = por %p1890_p7, %p1889_p6 }
  0x31   :  { %p1892_p9 = pnand %p1891_p8, %p1885_p5 }
  0x33   :  { %1895 = shalt.err (!%p1892_p9)
}
  0x34   :  { %50 = dma.hbm_to_vmem [thread:$0]  %s2293_s2, 2048, %s45_s23, [#allocation7], %s1950_s9, %s1950_s9, %s1951_s10  }
  0x35   :  { %s1896_s15 = scalar_lea.hbm %s2295_s4, 2048 }
  0x36   :  { %p1897_p10 = scmp.ne.s32.totalorder %s2295_s4, %s1896_s15  ;;  %p1900_p11 = scmp.lt.u32.totalorder %s1896_s15, %s2295_s4 }
  0x38   :  { %p1902_p12 = pnand %p1900_p11, %p1897_p10 }
  0x3a   :  { %1905 = shalt.err (!%p1902_p12)
}
  0x3b   :  { %s1906_s20 = scalar_lea.vmem %s2030_s26, 2048  ;;  %p1911_p0 = scmp.lt.s32.totalorder %s2030_s26, %s2030_s26 }
  0x3c   :  { %p1907_p13 = scmp.ne.s32.totalorder %s2030_s26, %s1906_s20  ;;  %p1912_p1 = scmp.lt.s32.totalorder %s1906_s20, %s1906_s20 }
  0x3e   :  { %p1913_p2 = por %p1912_p1, %p1911_p0 }
  0x40   :  { %p1914_p3 = pnand %p1913_p2, %p1907_p13 }
  0x42   :  { %1917 = shalt.err (!%p1914_p3)
}
  0x43   :  { %64 = dma.hbm_to_vmem [thread:$0]  %s2295_s4, 2048, %s2030_s26, [#allocation10], %s1950_s9, %s1950_s9, %s1951_s10  }
  0x44   :  { %1940 = dma.done.wait [#allocation4], 1024  }
  0x45   :  { %1941 = vsyncadd [#allocation4], 4294966272 }
  0x46   :  { %1942 = dma.done.wait [#allocation7], 4096  }
  0x47   :  { %1943 = vsyncadd [#allocation7], 4294963200 }
  0x48   :  { %1944 = dma.done.wait [#allocation10], 2048  }
  0x49   :  { %1945 = vsyncadd [#allocation10], 4294965248  ;;  %v1954_v0 = vmov 0.0|0.0   ;;  %vm1955_vm0 = vmmov 0   ;;  %v1956_v1 = vmov 0.0   ;;  %v87_v2 = vld [vmem:[#allocation6] sm:$0xff] }
  0x4a   :  { %1580 = vmatprep.subr.bf16.mxu1 %v1954_v0  ;;  %1256 = vmatprep.mubr.msk.f32.mxu1 %vm1955_vm0, %v1956_v1  ;;  %v88_v3 = vld [vmem:[#allocation6 + $0x8] sm:$0xff]  ;;  %v223_v4 = vld [vmem:[#allocation8] sm:$0xff]  ;;  %v89_v7 = vld [vmem:[#allocation6 + $0x10] sm:$0xff] }
  0x4b   :  { %v1548_v5 = vpack.c.bf16 %v88_v3, %v87_v2  ;;  %v224_v6 = vld [vmem:[#allocation8 + $0x8] sm:$0xff]  ;;  %v90_v8 = vld [vmem:[#allocation6 + $0x18] sm:$0xff]  ;;  %v225_v11 = vld [vmem:[#allocation8 + $0x10] sm:$0xff] }
  0x4c   :  { %v2070_v9 = vpack.c.bf16 %v224_v6, %v223_v4  ;;  %v1552_v10 = vpack.c.bf16 %v90_v8, %v89_v7  ;;  %v226_v12 = vld [vmem:[#allocation8 + $0x18] sm:$0xff]  ;;  %v91_v13 = vld [vmem:[#allocation6 + $0x20] sm:$0xff]  ;;  %v92_v14 = vld [vmem:[#allocation6 + $0x28] sm:$0xff] }
  0x4d   :  { %1549 = vmatprep.subr.bf16.mxu0 %v1548_v5  ;;  %v2073_v15 = vpack.c.bf16 %v226_v12, %v225_v11  ;;  %v1556_v16 = vpack.c.bf16 %v92_v14, %v91_v13  ;;  %v227_v17 = vld [vmem:[#allocation8 + $0x20] sm:$0xff]  ;;  %v228_v18 = vld [vmem:[#allocation8 + $0x28] sm:$0xff]  ;;  %v93_v19 = vld [vmem:[#allocation6 + $0x30] sm:$0xff] }
  0x4e   :  { %1551 = vmatpush3.bf16.msra.mxu0 %v1548_v5  ;;  %1582 = vmatpush3.bf16.msra.mxu1 %v2070_v9  ;;  %v94_v20 = vld [vmem:[#allocation6 + $0x38] sm:$0xff]  ;;  %v2077_v21 = vpack.c.bf16 %v228_v18, %v227_v17  ;;  %v229_v23 = vld [vmem:[#allocation8 + $0x30] sm:$0xff]  ;;  %v95_v25 = vld [vmem:[#allocation6 + $0x40] sm:$0xff] }
  0x4f   :  { %1553 = vmatprep.subr.bf16.mxu0 %v1552_v10  ;;  %1583 = vmatprep.subr.bf16.mxu1 %v1954_v0  ;;  %v1560_v22 = vpack.c.bf16 %v94_v20, %v93_v19  ;;  %v230_v24 = vld [vmem:[#allocation8 + $0x38] sm:$0xff]  ;;  %v96_v26 = vld [vmem:[#allocation6 + $0x48] sm:$0xff]  ;;  %v79_v27 = vld [vmem:[#allocation3] sm:$0xff] }
  0x50   :  { %1212 = vmatprep.mubr.f32.mxu0 %v79_v27  ;;  %v2081_v28 = vpack.c.bf16 %v230_v24, %v229_v23  ;;  %v1564_v29 = vpack.c.bf16 %v96_v26, %v95_v25  ;;  %v231_v30 = vld [vmem:[#allocation8 + $0x40] sm:$0xff]  ;;  %v232_v31 = vld [vmem:[#allocation8 + $0x48] sm:$0xff]  ;;  %v97_v32 = vld [vmem:[#allocation6 + $0x50] sm:$0xff] }
  0x51   :  { %v98_v33 = vld [vmem:[#allocation6 + $0x58] sm:$0xff]  ;;  %v2085_v34 = vpack.c.bf16 %v232_v31, %v231_v30  ;;  %v233_v36 = vld [vmem:[#allocation8 + $0x50] sm:$0xff]  ;;  %v99_v38 = vld [vmem:[#allocation6 + $0x60] sm:$0xff] }
  0x52   :  { %1555 = vmatpush3.bf16.msra.mxu0 %v1552_v10  ;;  %1585 = vmatpush3.bf16.msra.mxu1 %v2073_v15  ;;  %v1568_v35 = vpack.c.bf16 %v98_v33, %v97_v32  ;;  %v234_v37 = vld [vmem:[#allocation8 + $0x58] sm:$0xff]  ;;  %v100_v39 = vld [vmem:[#allocation6 + $0x68] sm:$0xff]  ;;  %v235_v42 = vld [vmem:[#allocation8 + $0x60] sm:$0xff] }
  0x53   :  { %1557 = vmatprep.subr.bf16.mxu0 %v1556_v16  ;;  %1586 = vmatprep.subr.bf16.mxu1 %v1954_v0  ;;  %v2089_v40 = vpack.c.bf16 %v234_v37, %v233_v36  ;;  %v1572_v41 = vpack.c.bf16 %v100_v39, %v99_v38  ;;  %v236_v43 = vld [vmem:[#allocation8 + $0x68] sm:$0xff]  ;;  %v101_v44 = vld [vmem:[#allocation6 + $0x70] sm:$0xff]  ;;  %v102_v45 = vld [vmem:[#allocation6 + $0x78] sm:$0xff] }
  0x54   :  { %v2093_v46 = vpack.c.bf16 %v236_v43, %v235_v42  ;;  %v1576_v47 = vpack.c.bf16 %v102_v45, %v101_v44  ;;  %v237_v48 = vld [vmem:[#allocation8 + $0x70] sm:$0xff]  ;;  %v238_v49 = vld [vmem:[#allocation8 + $0x78] sm:$0xff]  ;;  %v80_v51 = vld [vmem:[#allocation3 + $0x8] sm:$0xff] }
  0x55   :  { %v2097_v50 = vpack.c.bf16 %v238_v49, %v237_v48  ;;  %v81_v52 = vld [vmem:[#allocation3 + $0x10] sm:$0xff]  ;;  %v82_v53 = vld [vmem:[#allocation3 + $0x18] sm:$0xff]  ;;  %v83_v54 = vld [vmem:[#allocation3 + $0x20] sm:$0xff] }
  0x56   :  { %1559 = vmatpush3.bf16.msra.mxu0 %v1556_v16  ;;  %1588 = vmatpush3.bf16.msra.mxu1 %v2077_v21  ;;  %v84_v55 = vld [vmem:[#allocation3 + $0x28] sm:$0xff]  ;;  %v85_v56 = vld [vmem:[#allocation3 + $0x30] sm:$0xff]  ;;  %v86_v57 = vld [vmem:[#allocation3 + $0x38] sm:$0xff] }
  0x57   :  { %1561 = vmatprep.subr.bf16.mxu0 %v1560_v22  ;;  %1589 = vmatprep.subr.bf16.mxu1 %v1954_v0  ;;  %v2143_v58 = vld [vmem:[%s2294_s3] ss:$0 sm:$0xff]  ;;  %v841_v36 = vld [vmem:[#allocation9 + $0x10] sm:$0xff]  ;;  %v842_v37 = vld [vmem:[#allocation9 + $0x18] sm:$0xff] }
  0x58   :  { %v1776_v38 = vpack.c.bf16 %v842_v37, %v841_v36  ;;  %v845_v42 = vld [vmem:[#allocation9 + $0x30] sm:$0xff]  ;;  %v846_v43 = vld [vmem:[#allocation9 + $0x38] sm:$0xff]  ;;  %v847_v45 = vld [vmem:[#allocation9 + $0x40] sm:$0xff] }
  0x59   :  { %v1784_v44 = vpack.c.bf16 %v846_v43, %v845_v42  ;;  %v849_v48 = vld [vmem:[#allocation9 + $0x50] sm:$0xff]  ;;  %v850_v49 = vld [vmem:[#allocation9 + $0x58] sm:$0xff] }
  0x5a   :  { %1563 = vmatpush3.bf16.msra.mxu0 %v1560_v22  ;;  %1591 = vmatpush3.bf16.msra.mxu1 %v2081_v28 }
  0x5b   :  { %1565 = vmatprep.subr.bf16.mxu0 %v1564_v29  ;;  %1592 = vmatprep.subr.bf16.mxu1 %v1954_v0 }
  0x5e   :  { %1567 = vmatpush3.bf16.msra.mxu0 %v1564_v29  ;;  %1594 = vmatpush3.bf16.msra.mxu1 %v2085_v34 }
  0x5f   :  { %1569 = vmatprep.subr.bf16.mxu0 %v1568_v35  ;;  %1595 = vmatprep.subr.bf16.mxu1 %v1954_v0 }
  0x62   :  { %1571 = vmatpush3.bf16.msra.mxu0 %v1568_v35  ;;  %1597 = vmatpush3.bf16.msra.mxu1 %v2089_v40 }
  0x63   :  { %1573 = vmatprep.subr.bf16.mxu0 %v1572_v41  ;;  %1598 = vmatprep.subr.bf16.mxu1 %v1954_v0 }
  0x66   :  { %1575 = vmatpush3.bf16.msra.mxu0 %v1572_v41  ;;  %1600 = vmatpush3.bf16.msra.mxu1 %v2093_v46  ;;  %v844_v41 = vld [vmem:[#allocation9 + $0x28] sm:$0xff] }
  0x67   :  { %1577 = vmatprep.subr.bf16.mxu0 %v1576_v47  ;;  %1601 = vmatprep.subr.bf16.mxu1 %v1954_v0 }
  0x6a   :  { %1579 = vmatpush3.bf16.msra.mxu0 %v1576_v47  ;;  %1603 = vmatpush3.bf16.msra.mxu1 %v2097_v50 }
  0x6b   :  { %1604 = vmatprep.subr.bf16.mxu0 %v1954_v0  ;;  %1628 = vmatprep.subr.bf16.mxu1 %v1954_v0 }
  0x6d   :  { %1213 = vmatmul.mubr.f32.vlgmr.msra.gmra.mrb[0].mxu0 %v80_v51  ;;  %1257 = vmatmul.mubr.f32.vlgmr.msra.gmra.mrb[0].mxu1 %v1956_v1  ;;  %v851_v51 = vld [vmem:[#allocation9 + $0x60] sm:$0xff] }
  0x6e   :  { %1606 = vmatpush3.bf16.msra.mxu0 %v2070_v9  ;;  %1630 = vmatpush3.bf16.msra.mxu1 %v2070_v9 }
  0x6f   :  { %1607 = vmatprep.subr.bf16.mxu0 %v1954_v0  ;;  %1631 = vmatprep.subr.bf16.mxu1 %v1954_v0 }
  0x70   :  { %1326 = vmatprep.mubr.msk.f32.mxu1 %vm1955_vm0, %v1956_v1  ;;  %1215 = vmatprep.mubr.f32.mxu0 %v81_v52  ;;  %v852_v52 = vld [vmem:[#allocation9 + $0x68] sm:$0xff] }
  0x71   :  { %1216 = vmatmul.mubr.f32.gmra.mrb[2].mxu0 %v82_v53  ;;  %v1796_v53 = vpack.c.bf16 %v852_v52, %v851_v51 }
  0x72   :  { %1609 = vmatpush3.bf16.msra.mxu0 %v2073_v15  ;;  %1633 = vmatpush3.bf16.msra.mxu1 %v2073_v15 }
  0x73   :  { %1610 = vmatprep.subr.bf16.mxu0 %v1954_v0  ;;  %1634 = vmatprep.subr.bf16.mxu1 %v1954_v0 }
  0x74   :  { %1218 = vmatprep.mubr.f32.mxu0 %v83_v54  ;;  %v853_v54 = vld [vmem:[#allocation9 + $0x70] sm:$0xff] }
  0x75   :  { %1219 = vmatmul.mubr.f32.gmra.mrb[4].mxu0 %v84_v55  ;;  %v854_v55 = vld [vmem:[#allocation9 + $0x78] sm:$0xff] }
  0x76   :  { %1612 = vmatpush3.bf16.msra.mxu0 %v2077_v21  ;;  %1636 = vmatpush3.bf16.msra.mxu1 %v2077_v21 }
  0x77   :  { %1613 = vmatprep.subr.bf16.mxu0 %v1954_v0  ;;  %1637 = vmatprep.subr.bf16.mxu1 %v1954_v0 }
  0x78   :  { %1221 = vmatprep.mubr.f32.mxu0 %v85_v56  ;;  %v1800_v56 = vpack.c.bf16 %v854_v55, %v853_v54 }
  0x79   :  { %1222 = vmatmul.mubr.f32.gmra.mrb[6].mxu0 %v86_v57 }
  0x7a   :  { %1615 = vmatpush3.bf16.msra.mxu0 %v2081_v28  ;;  %1639 = vmatpush3.bf16.msra.mxu1 %v2081_v28 }
  0x7b   :  { %1616 = vmatprep.subr.bf16.mxu0 %v1954_v0  ;;  %1640 = vmatprep.subr.bf16.mxu1 %v1954_v0 }
  0x7c   :  { %1291 = vmatprep.mubr.msk.f32.mxu0 %vm1955_vm0, %v1956_v1 }
  0x7e   :  { %1618 = vmatpush3.bf16.msra.mxu0 %v2085_v34  ;;  %1642 = vmatpush3.bf16.msra.mxu1 %v2085_v34 }
  0x7f   :  { %1619 = vmatprep.subr.bf16.mxu0 %v1954_v0  ;;  %1643 = vmatprep.subr.bf16.mxu1 %v1954_v0 }
  0x82   :  { %1621 = vmatpush3.bf16.msra.mxu0 %v2089_v40  ;;  %1645 = vmatpush3.bf16.msra.mxu1 %v2089_v40 }
  0x83   :  { %1622 = vmatprep.subr.bf16.mxu0 %v1954_v0  ;;  %1646 = vmatprep.subr.bf16.mxu1 %v1954_v0 }
  0x86   :  { %1624 = vmatpush3.bf16.msra.mxu0 %v2093_v46  ;;  %1648 = vmatpush3.bf16.msra.mxu1 %v2093_v46 }
  0x87   :  { %1625 = vmatprep.subr.bf16.mxu0 %v1954_v0  ;;  %1649 = vmatprep.subr.bf16.mxu1 %v1954_v0 }
  0x8a   :  { %1627 = vmatpush3.bf16.msra.mxu0 %v2097_v50  ;;  %1651 = vmatpush3.bf16.msra.mxu1 %v2097_v50 }
  0x8b   :  { %1652 = vmatprep.subr.bf16.mxu0 %v1954_v0  ;;  %1676 = vmatprep.subr.bf16.mxu1 %v1954_v0 }
 0x140   :  { %v1214_v59 = vpop.f32.mrb[0].mxu0  ;;  %v306_v60 = vpop.f32.mrb[0].mxu1 }
 0x141   :  { %v176_v61 = vpop.f32.mrb[1].mxu0  ;;  %v1258_v62 = vpop.f32.mrb[1].mxu1  ;;  %v182_v11 = vadd.f32 %v1214_v59, %v2143_v58 }
 0x142   :  { %v177_v63 = vadd.f32 %v2143_v58, %v176_v61 }
 0x144   :  { %v310_v2 = vadd.f32 %v306_v60, %v177_v63  ;;  %v1217_v4 = vpop.f32.mrb[2].mxu0  ;;  %v995_v63 = vld [vmem:[%s2296_s5] ss:$0 sm:$0xff]  ;;  %s1957_s5 = smov [#allocation11]  }
 0x145   :  { %v186_v5 = vpop.f32.mrb[3].mxu0  ;;  %v192_v23 = vadd.f32 %v1217_v4, %v2143_v58  ;;  %s980_s23 = sshll.u32 %s1957_s5, 4  ;;  %s981_s23 = int_to_ptr.vmem [resolvable:$true] %s980_s23 }
 0x146   :  { %1814 = vtanh.f32 %v310_v2  ;;  %v187_v17 = vadd.f32 %v2143_v58, %v186_v5  ;;  %s1918_s25 = scalar_lea.vmem %s981_s23, 1024  ;;  %p1923_p5 = scmp.lt.s32.totalorder %s981_s23, %s981_s23 }
 0x147   :  { %p1919_p4 = scmp.ne.s32.totalorder %s981_s23, %s1918_s25  ;;  %p1924_p6 = scmp.lt.s32.totalorder %s1918_s25, %s1918_s25 }
 0x148   :  { %v2167_v6 = vpop.f32.mrb[4].mxu0 }
 0x149   :  { %v2169_v7 = vpop.f32.mrb[5].mxu0  ;;  %p1925_p7 = por %p1924_p6, %p1923_p5 }
 0x14a   :  { %v197_v29 = vadd.f32 %v2143_v58, %v2169_v7 }
 0x14b   :  { %p1926_p8 = pnand %p1925_p7, %p1919_p4 }
 0x14c   :  { %v2171_v8 = vpop.f32.mrb[6].mxu0 }
 0x14d   :  { %v2173_v10 = vpop.f32.mrb[7].mxu0 }
 0x14e   :  { %v207_v57 = vadd.f32 %v2143_v58, %v2173_v10 }
 0x150   :  { %v2146_v3 = vpop.eup %1814 }
 0x151   :  { %1292 = vmatmul.mubr.f32.vlgmr.msra.gmra.mrb[8].mxu0 %v2146_v3 }
 0x152   :  { %1654 = vmatpush3.bf16.msra.mxu0 %v2070_v9  ;;  %1361 = vmatprep.mubr.msk.f32.mxu0 %vm1955_vm0, %v1956_v1 }
 0x153   :  { %1655 = vmatprep.subr.bf16.mxu0 %v1954_v0 }
 0x156   :  { %1657 = vmatpush3.bf16.msra.mxu0 %v2073_v15 }
 0x157   :  { %1658 = vmatprep.subr.bf16.mxu0 %v1954_v0 }
 0x15a   :  { %1660 = vmatpush3.bf16.msra.mxu0 %v2077_v21 }
 0x15b   :  { %1661 = vmatprep.subr.bf16.mxu0 %v1954_v0 }
 0x15e   :  { %1663 = vmatpush3.bf16.msra.mxu0 %v2081_v28 }
 0x15f   :  { %1664 = vmatprep.subr.bf16.mxu0 %v1954_v0 }
 0x162   :  { %1666 = vmatpush3.bf16.msra.mxu0 %v2085_v34 }
 0x163   :  { %1667 = vmatprep.subr.bf16.mxu0 %v1954_v0 }
 0x166   :  { %1669 = vmatpush3.bf16.msra.mxu0 %v2089_v40 }
 0x167   :  { %1670 = vmatprep.subr.bf16.mxu0 %v1954_v0 }
 0x16a   :  { %1672 = vmatpush3.bf16.msra.mxu0 %v2093_v46 }
 0x16b   :  { %1673 = vmatprep.subr.bf16.mxu0 %v1954_v0 }
 0x16e   :  { %1675 = vmatpush3.bf16.msra.mxu0 %v2097_v50 }
 0x16f   :  { %1700 = vmatprep.subr.bf16.mxu0 %v1954_v0 }
 0x224   :  { %v380_v12 = vpop.f32.mrb[8].mxu0 }
 0x225   :  { %v384_v13 = vadd.f32 %v380_v12, %v182_v11  ;;  %v1293_v14 = vpop.f32.mrb[9].mxu0 }
 0x227   :  { %1816 = vtanh.f32 %v384_v13 }
 0x231   :  { %v2176_v16 = vpop.eup %1816 }
 0x232   :  { %1327 = vmatmul.mubr.f32.vlgmr.msra.gmra.mrb[2].mxu1 %v2176_v16 }
 0x233   :  { %1678 = vmatpush3.bf16.msra.mxu1 %v2070_v9  ;;  %1396 = vmatprep.mubr.msk.f32.mxu1 %vm1955_vm0, %v1956_v1 }
 0x234   :  { %1679 = vmatprep.subr.bf16.mxu1 %v1954_v0 }
 0x237   :  { %1681 = vmatpush3.bf16.msra.mxu1 %v2073_v15 }
 0x238   :  { %1682 = vmatprep.subr.bf16.mxu1 %v1954_v0 }
 0x23b   :  { %1684 = vmatpush3.bf16.msra.mxu1 %v2077_v21 }
 0x23c   :  { %1685 = vmatprep.subr.bf16.mxu1 %v1954_v0 }
 0x23f   :  { %1687 = vmatpush3.bf16.msra.mxu1 %v2081_v28 }
 0x240   :  { %1688 = vmatprep.subr.bf16.mxu1 %v1954_v0 }
 0x243   :  { %1690 = vmatpush3.bf16.msra.mxu1 %v2085_v34 }
 0x244   :  { %1691 = vmatprep.subr.bf16.mxu1 %v1954_v0 }
 0x247   :  { %1693 = vmatpush3.bf16.msra.mxu1 %v2089_v40 }
 0x248   :  { %1694 = vmatprep.subr.bf16.mxu1 %v1954_v0 }
 0x24b   :  { %1696 = vmatpush3.bf16.msra.mxu1 %v2093_v46 }
 0x24c   :  { %1697 = vmatprep.subr.bf16.mxu1 %v1954_v0 }
 0x24f   :  { %1699 = vmatpush3.bf16.msra.mxu1 %v2097_v50 }
 0x250   :  { %1724 = vmatprep.subr.bf16.mxu1 %v1954_v0 }
 0x305   :  { %v454_v18 = vpop.f32.mrb[2].mxu1 }
 0x306   :  { %v458_v19 = vadd.f32 %v454_v18, %v187_v17  ;;  %v1328_v20 = vpop.f32.mrb[3].mxu1  ;;  %v212_v17 = vadd.f32 %v2171_v8, %v2143_v58 }
 0x308   :  { %1818 = vtanh.f32 %v458_v19 }
 0x312   :  { %v2198_v22 = vpop.eup %1818 }
 0x313   :  { %1362 = vmatmul.mubr.f32.vlgmr.msra.gmra.mrb[10].mxu0 %v2198_v22 }
 0x314   :  { %1702 = vmatpush3.bf16.msra.mxu0 %v2070_v9  ;;  %1431 = vmatprep.mubr.msk.f32.mxu0 %vm1955_vm0, %v1956_v1 }
 0x315   :  { %1703 = vmatprep.subr.bf16.mxu0 %v1954_v0 }
 0x318   :  { %1705 = vmatpush3.bf16.msra.mxu0 %v2073_v15 }
 0x319   :  { %1706 = vmatprep.subr.bf16.mxu0 %v1954_v0 }
 0x31c   :  { %1708 = vmatpush3.bf16.msra.mxu0 %v2077_v21 }
 0x31d   :  { %1709 = vmatprep.subr.bf16.mxu0 %v1954_v0 }
 0x320   :  { %1711 = vmatpush3.bf16.msra.mxu0 %v2081_v28 }
 0x321   :  { %1712 = vmatprep.subr.bf16.mxu0 %v1954_v0 }
 0x324   :  { %1714 = vmatpush3.bf16.msra.mxu0 %v2085_v34 }
 0x325   :  { %1715 = vmatprep.subr.bf16.mxu0 %v1954_v0 }
 0x328   :  { %1717 = vmatpush3.bf16.msra.mxu0 %v2089_v40 }
 0x329   :  { %1718 = vmatprep.subr.bf16.mxu0 %v1954_v0 }
 0x32c   :  { %1720 = vmatpush3.bf16.msra.mxu0 %v2093_v46 }
 0x32d   :  { %1721 = vmatprep.subr.bf16.mxu0 %v1954_v0 }
 0x330   :  { %1723 = vmatpush3.bf16.msra.mxu0 %v2097_v50 }
 0x331   :  { %1748 = vmatprep.subr.bf16.mxu0 %v1954_v0 }
 0x3e6   :  { %v528_v24 = vpop.f32.mrb[10].mxu0 }
 0x3e7   :  { %v532_v25 = vadd.f32 %v528_v24, %v192_v23  ;;  %v1363_v26 = vpop.f32.mrb[11].mxu0 }
 0x3e9   :  { %1820 = vtanh.f32 %v532_v25 }
 0x3f3   :  { %v2220_v27 = vpop.eup %1820 }
 0x3f4   :  { %1397 = vmatmul.mubr.f32.vlgmr.msra.gmra.mrb[4].mxu1 %v2220_v27 }
 0x3f5   :  { %1726 = vmatpush3.bf16.msra.mxu1 %v2070_v9  ;;  %1466 = vmatprep.mubr.msk.f32.mxu1 %vm1955_vm0, %v1956_v1 }
 0x3f6   :  { %1727 = vmatprep.subr.bf16.mxu1 %v1954_v0 }
 0x3f9   :  { %1729 = vmatpush3.bf16.msra.mxu1 %v2073_v15 }
 0x3fa   :  { %1730 = vmatprep.subr.bf16.mxu1 %v1954_v0 }
 0x3fd   :  { %1732 = vmatpush3.bf16.msra.mxu1 %v2077_v21 }
 0x3fe   :  { %1733 = vmatprep.subr.bf16.mxu1 %v1954_v0 }
 0x401   :  { %1735 = vmatpush3.bf16.msra.mxu1 %v2081_v28 }
 0x402   :  { %1736 = vmatprep.subr.bf16.mxu1 %v1954_v0 }
 0x405   :  { %1738 = vmatpush3.bf16.msra.mxu1 %v2085_v34 }
 0x406   :  { %1739 = vmatprep.subr.bf16.mxu1 %v1954_v0 }
 0x409   :  { %1741 = vmatpush3.bf16.msra.mxu1 %v2089_v40 }
 0x40a   :  { %1742 = vmatprep.subr.bf16.mxu1 %v1954_v0 }
 0x40d   :  { %1744 = vmatpush3.bf16.msra.mxu1 %v2093_v46 }
 0x40e   :  { %1745 = vmatprep.subr.bf16.mxu1 %v1954_v0 }
 0x411   :  { %1747 = vmatpush3.bf16.msra.mxu1 %v2097_v50 }
 0x4c7   :  { %v602_v30 = vpop.f32.mrb[4].mxu1 }
 0x4c8   :  { %v606_v31 = vadd.f32 %v602_v30, %v197_v29  ;;  %v1398_v32 = vpop.f32.mrb[5].mxu1 }
 0x4ca   :  { %1822 = vtanh.f32 %v606_v31 }
 0x4d4   :  { %v2242_v33 = vpop.eup %1822 }
 0x4d5   :  { %1432 = vmatmul.mubr.f32.vlgmr.msra.gmra.mrb[12].mxu0 %v2242_v33 }
 0x4d6   :  { %1750 = vmatpush3.bf16.msra.mxu0 %v2070_v9  ;;  %1501 = vmatprep.mubr.msk.f32.mxu0 %vm1955_vm0, %v1956_v1  ;;  %v839_v1 = vld [vmem:[#allocation9] sm:$0xff]  ;;  %v840_v9 = vld [vmem:[#allocation9 + $0x8] sm:$0xff] }
 0x4d7   :  { %1751 = vmatprep.subr.bf16.mxu0 %v1954_v0 }
 0x4da   :  { %1753 = vmatpush3.bf16.msra.mxu0 %v2073_v15  ;;  %v1772_v15 = vpack.c.bf16 %v840_v9, %v839_v1 }
 0x4db   :  { %1754 = vmatprep.subr.bf16.mxu0 %v1954_v0 }
 0x4dc   :  { %1773 = vmatprep.subr.bf16.mxu1 %v1772_v15 }
 0x4de   :  { %1756 = vmatpush3.bf16.msra.mxu0 %v2077_v21  ;;  %v202_v21 = vadd.f32 %v2167_v6, %v2143_v58 }
 0x4df   :  { %1757 = vmatprep.subr.bf16.mxu0 %v1954_v0 }
 0x4e2   :  { %1759 = vmatpush3.bf16.msra.mxu0 %v2081_v28 }
 0x4e3   :  { %1760 = vmatprep.subr.bf16.mxu0 %v1954_v0 }
 0x4e6   :  { %1762 = vmatpush3.bf16.msra.mxu0 %v2085_v34 }
 0x4e7   :  { %1763 = vmatprep.subr.bf16.mxu0 %v1954_v0 }
 0x4ea   :  { %1765 = vmatpush3.bf16.msra.mxu0 %v2089_v40  ;;  %v843_v40 = vld [vmem:[#allocation9 + $0x20] sm:$0xff] }
 0x4eb   :  { %1766 = vmatprep.subr.bf16.mxu0 %v1954_v0 }
 0x4ee   :  { %1768 = vmatpush3.bf16.msra.mxu0 %v2093_v46  ;;  %v848_v46 = vld [vmem:[#allocation9 + $0x48] sm:$0xff] }
 0x4ef   :  { %1769 = vmatprep.subr.bf16.mxu0 %v1954_v0  ;;  %v1780_v0 = vpack.c.bf16 %v844_v41, %v843_v40  ;;  %v1788_v47 = vpack.c.bf16 %v848_v46, %v847_v45 }
 0x4f2   :  { %1771 = vmatpush3.bf16.msra.mxu0 %v2097_v50  ;;  %v1792_v50 = vpack.c.bf16 %v850_v49, %v849_v48 }
 0x5a8   :  { %v676_v28 = vpop.f32.mrb[12].mxu0 }
 0x5a9   :  { %v680_v34 = vadd.f32 %v676_v28, %v202_v21  ;;  %v1433_v35 = vpop.f32.mrb[13].mxu0 }
 0x5ab   :  { %1824 = vtanh.f32 %v680_v34 }
 0x5b5   :  { %v1825_v39 = vpop.eup %1824 }
 0x5b6   :  { %1467 = vmatmul.mubr.f32.vlgmr.msra.gmra.mrb[6].mxu1 %v1825_v39 }
 0x5b7   :  { %1775 = vmatpush3.bf16.msra.mxu1 %v1772_v15  ;;  %1536 = vmatprep.mubr.f32.mxu1 %v2146_v3 }
 0x5b8   :  { %1777 = vmatprep.subr.bf16.mxu1 %v1776_v38 }
 0x5bb   :  { %1779 = vmatpush3.bf16.msra.mxu1 %v1776_v38 }
 0x5bc   :  { %1781 = vmatprep.subr.bf16.mxu1 %v1780_v0 }
 0x5bf   :  { %1783 = vmatpush3.bf16.msra.mxu1 %v1780_v0 }
 0x5c0   :  { %1785 = vmatprep.subr.bf16.mxu1 %v1784_v44 }
 0x5c3   :  { %1787 = vmatpush3.bf16.msra.mxu1 %v1784_v44 }
 0x5c4   :  { %1789 = vmatprep.subr.bf16.mxu1 %v1788_v47 }
 0x5c7   :  { %1791 = vmatpush3.bf16.msra.mxu1 %v1788_v47 }
 0x5c8   :  { %1793 = vmatprep.subr.bf16.mxu1 %v1792_v50 }
 0x5cb   :  { %1795 = vmatpush3.bf16.msra.mxu1 %v1792_v50 }
 0x5cc   :  { %1797 = vmatprep.subr.bf16.mxu1 %v1796_v53 }
 0x5cf   :  { %1799 = vmatpush3.bf16.msra.mxu1 %v1796_v53 }
 0x5d0   :  { %1801 = vmatprep.subr.bf16.mxu1 %v1800_v56 }
 0x5d3   :  { %1803 = vmatpush3.bf16.msra.mxu1 %v1800_v56 }
 0x5d6   :  { %1537 = vmatmul.mubr.f32.vlgmr.msra.gmra.mrb[8].mxu1 %v2176_v16 }
 0x5d7   :  { %1539 = vmatprep.mubr.f32.mxu1 %v2198_v22 }
 0x5da   :  { %1540 = vmatmul.mubr.f32.gmra.mrb[10].mxu1 %v2220_v27 }
 0x5db   :  { %1542 = vmatprep.mubr.f32.mxu1 %v2242_v33 }
 0x5de   :  { %1543 = vmatmul.mubr.f32.gmra.mrb[12].mxu1 %v1825_v39 }
 0x689   :  { %v750_v59 = vpop.f32.mrb[6].mxu1 }
 0x68a   :  { %v754_v60 = vadd.f32 %v750_v59, %v207_v57  ;;  %v1468_v61 = vpop.f32.mrb[7].mxu1 }
 0x68c   :  { %1826 = vtanh.f32 %v754_v60 }
 0x696   :  { %v1827_v62 = vpop.eup %1826 }
 0x697   :  { %1502 = vmatmul.mubr.f32.vlgmr.msra.gmra.mrb[14].mxu0 %v1827_v62  ;;  %1545 = vmatprep.mubr.f32.mxu1 %v1827_v62 }
 0x6a9   :  { %v1538_v2 = vpop.f32.mrb[8].mxu1 }
 0x6aa   :  { %v934_v3 = vadd.f32 %v1538_v2, %v995_v63  ;;  %v928_v4 = vpop.f32.mrb[9].mxu1 }
 0x6ab   :  { %v929_v5 = vadd.f32 %v995_v63, %v928_v4 }
 0x6ac   :  { %968 = vst [vmem:[#allocation11 + $0x8] sm:$0xff] %v934_v3 }
 0x6ad   :  { %967 = vst [vmem:[#allocation11] sm:$0xff] %v929_v5  ;;  %v1541_v6 = vpop.f32.mrb[10].mxu1 }
 0x6ae   :  { %v944_v7 = vadd.f32 %v1541_v6, %v995_v63  ;;  %v938_v10 = vpop.f32.mrb[11].mxu1 }
 0x6af   :  { %v939_v11 = vadd.f32 %v995_v63, %v938_v10 }
 0x6b0   :  { %970 = vst [vmem:[#allocation11 + $0x18] sm:$0xff] %v944_v7 }
 0x6b1   :  { %969 = vst [vmem:[#allocation11 + $0x10] sm:$0xff] %v939_v11  ;;  %v1544_v12 = vpop.f32.mrb[12].mxu1 }
 0x6b2   :  { %v954_v13 = vadd.f32 %v1544_v12, %v995_v63  ;;  %v948_v14 = vpop.f32.mrb[13].mxu1 }
 0x6b3   :  { %v949_v16 = vadd.f32 %v995_v63, %v948_v14 }
 0x6b4   :  { %972 = vst [vmem:[#allocation11 + $0x28] sm:$0xff] %v954_v13 }
 0x6b5   :  { %971 = vst [vmem:[#allocation11 + $0x20] sm:$0xff] %v949_v16 }
 0x76a   :  { %v824_v18 = vpop.f32.mrb[14].mxu0 }
 0x76b   :  { %v828_v19 = vadd.f32 %v824_v18, %v212_v17  ;;  %v1503_v20 = vpop.f32.mrb[15].mxu0 }
 0x76d   :  { %1828 = vtanh.f32 %v828_v19 }
 0x777   :  { %v1829_v22 = vpop.eup %1828 }
 0x778   :  { %1546 = vmatmul.mubr.f32.gmra.mrb[14].mxu1 %v1829_v22 }
 0x84b   :  { %v1547_v23 = vpop.f32.mrb[14].mxu1 }
 0x84c   :  { %v964_v24 = vadd.f32 %v1547_v23, %v995_v63  ;;  %v958_v25 = vpop.f32.mrb[15].mxu1 }
 0x84d   :  { %v959_v26 = vadd.f32 %v995_v63, %v958_v25 }
 0x84e   :  { %974 = vst [vmem:[#allocation11 + $0x38] sm:$0xff] %v964_v24 }
 0x84f   :  { %973 = vst [vmem:[#allocation11 + $0x30] sm:$0xff] %v959_v26 }
 0x850   :  { %1929 = shalt.err (!%p1926_p8)
}
 0x851   :  { %s1930_s28 = scalar_lea.hbm %s2297_s6, 1024 }
 0x852   :  { %p1931_p9 = scmp.ne.s32.totalorder %s2297_s6, %s1930_s28  ;;  %p1934_p10 = scmp.lt.u32.totalorder %s1930_s28, %s2297_s6 }
 0x854   :  { %p1936_p11 = pnand %p1934_p10, %p1931_p9 }
 0x856   :  { %1939 = shalt.err (!%p1936_p11)
}
 0x857   :  { %986 = dma.vmem_to_hbm [thread:$0]  %s981_s23, 1024, %s2297_s6, [#allocation5], %s1950_s9, %s1950_s9, %s1951_s10  }
 0x858   :  { %1946 = dma.done.wait [#allocation5], 1024  }
 0x859   :  { %1947 = vsyncadd [#allocation5], 4294966272 }
 0x85a   :  { %990 = vsyncpa [#allocation4], 1 }
 0x85b   :  { %991 = vsyncpa [#allocation7], 1 }
 0x85c   :  { %992 = vsyncpa [#allocation10], 1 }
 0x85d   :  { %993 = vsyncpa [#allocation5], 1 }

</bundles_post_ra>
